<compile_context>
chip_gen: v5e
topology: v5e:2x2
jax: 0.10.0
libtpu: 0.0.40
codegen_flags: <defaults>
</compile_context>

<pallas_src>
import math
import functools

import jax
import jax.numpy as jnp
from jax import lax
from jax.experimental import pallas as pl
from jax.experimental.pallas import tpu as pltpu


def _residual_dwconv_kernel(x_ref, p_ref, o_ref, *, H, W, K):
    """Fused: depthwise KxK conv -> exact GELU -> BatchNorm(eval) -> + x.

    x_ref : (1, TC, H*W)    input block (channels on sublanes, H*W on lanes)
    p_ref : (TC, K*K + 3)   packed per-channel params:
                            [:, :K*K]  conv taps (t = ky*K + kx)
                            [:, K*K]   conv bias
                            [:, K*K+1] BN scale  = gamma / sqrt(var + eps)
                            [:, K*K+2] BN shift  = beta - mean * scale
    o_ref : (1, TC, H*W)
    """
    HW = H * W
    R = K // 2
    KK = K * K

    x = x_ref[0].astype(jnp.float32)                       # (TC, HW)
    p = p_ref[...].astype(jnp.float32)                     # (TC, KK+3)
    w = p[:, :KK]
    bias = p[:, KK:KK + 1]
    scale = p[:, KK + 1:KK + 2]
    shift = p[:, KK + 2:KK + 3]

    # ---- Boundary predicates, hoisted: 4 edge compares + corner ANDs, once. ----
    idx = lax.broadcasted_iota(jnp.int32, (1, HW), 1)      # flat spatial index
    if (W & (W - 1)) == 0:
        col = jnp.bitwise_and(idx, W - 1)                  # idx % W, pow2 fast path
    else:
        col = idx % W                                      # non-pow2 W: one-time cost
    row_ok = {0: None}
    col_ok = {0: None}
    for d in range(1, R + 1):
        row_ok[d] = idx < (H - d) * W                      # reading row r + d
        row_ok[-d] = idx >= d * W                          # reading row r - d
        col_ok[d] = col < (W - d)                          # reading col c + d
        col_ok[-d] = col >= d                              # reading col c - d
    masks = {}
    for dy in range(-R, R + 1):
        for dx in range(-R, R + 1):
            if dy == 0 and dx == 0:
                continue
            ry, cx = row_ok[dy], col_ok[dx]
            if ry is None:
                masks[(dy, dx)] = cx
            elif cx is None:
                masks[(dy, dx)] = ry
            else:
                masks[(dy, dx)] = jnp.logical_and(ry, cx)

    # ---- Accumulator starts from center tap + bias (no zero-init pass). ----
    ctr = R * K + R
    acc = x * w[:, ctr:ctr + 1] + bias

    # Remaining taps: lane-roll of the flattened spatial axis + boundary mask.
    for dy in range(-R, R + 1):
        for dx in range(-R, R + 1):
            if dy == 0 and dx == 0:
                continue
            t = (dy + R) * K + (dx + R)
            s = dy * W + dx
            # shifted[c, p] = x[c, p + s]  (XLU roll; wrapped lanes get masked)
            shifted = pltpu.roll(x, shift=(-s) % HW, axis=1)
            shifted = jnp.where(masks[(dy, dx)], shifted, 0.0)
            acc = acc + shifted * w[:, t:t + 1]

    # Exact (erf-based) GELU, matching torch.nn.GELU() default.
    g = 0.5 * acc * (1.0 + lax.erf(acc * (1.0 / math.sqrt(2.0))))

    # Eval-mode BatchNorm folded into per-channel scale/shift, then residual.
    o_ref[0] = (g * scale + shift + x).astype(o_ref.dtype)


def _pick_tc(C, HW, target_block_bytes=1 << 20, max_block_bytes=2 << 20):
    """Channel-tile: sublane-aligned (multiple of 8), divides C, and the f32
    (1, TC, HW) block lands around 0.5-2 MiB so per-step overhead amortizes
    while double-buffered I/O stays well inside VMEM on v5e/v6e/v7x."""
    if C % 8 != 0:
        return C  # full-dim channel block: still correct, just not sublane-tiled
    bytes_per_channel = 4 * HW
    tc = int(round(target_block_bytes / (bytes_per_channel * 8.0))) * 8
    tc = max(8, min(tc, C))
    while tc > 8 and (tc * bytes_per_channel > max_block_bytes or C % tc != 0):
        tc -= 8
    if C % tc != 0:
        tc = 8
    return tc


def residual_dwconv_block(x_nchw, w, b, gamma, beta, run_mean, run_var,
                          eps=1e-5, kernel_size=3):
    """x_nchw: (N, C, H, W) float32.  Returns (N, C, H, W)."""
    N, C, H, W = x_nchw.shape
    K = kernel_size
    KK = K * K
    HW = H * W

    # Free reshape: collapse spatial dims onto the lane axis (no transpose, no pad).
    x = x_nchw.reshape(N, C, HW)

    # Fold BN (eval) into per-channel scale/shift and pack all per-channel
    # parameters into ONE (C, KK+3) array -> a single small DMA per ci block.
    inv = gamma / jnp.sqrt(run_var + eps)
    params = jnp.concatenate(
        [w.reshape(C, KK).astype(jnp.float32),
         b.reshape(C, 1).astype(jnp.float32),
         inv.reshape(C, 1).astype(jnp.float32),
         (beta - run_mean * inv).reshape(C, 1).astype(jnp.float32)],
        axis=1)

    # Adaptive channel tile + guard that a couple of parallel grid steps exist
    # (v7x has 2 TensorCores per chip).
    TC = _pick_tc(C, HW)
    while N * (C // TC) < 2 and TC % 16 == 0 and C % (TC // 2) == 0:
        TC //= 2
    # Grid = (C//TC, N): N innermost, so the param block index only changes
    # with ci and is not re-fetched every step.
    grid = (C // TC, N)

    kernel = functools.partial(_residual_dwconv_kernel, H=H, W=W, K=K)

    out = pl.pallas_call(
        kernel,
        out_shape=jax.ShapeDtypeStruct((N, C, HW), x.dtype),
        grid_spec=pltpu.PrefetchScalarGridSpec(
            num_scalar_prefetch=0,
            grid=grid,
            in_specs=[
                pl.BlockSpec((1, TC, HW), lambda ci, n: (n, ci, 0)),
                pl.BlockSpec((TC, KK + 3), lambda ci, n: (ci, 0)),
            ],
            out_specs=pl.BlockSpec((1, TC, HW), lambda ci, n: (n, ci, 0)),
        ),
        compiler_params=pltpu.CompilerParams(
            dimension_semantics=("parallel", "parallel"),
            vmem_limit_bytes=32 * 1024 * 1024),
    )(x, params)

    return out.reshape(N, C, H, W)


def _reference(x_nchw, w, b, gamma, beta, run_mean, run_var, eps=1e-5):
    """Pure-JAX reference: depthwise conv + exact GELU + eval BN + residual (NCHW)."""
    C = x_nchw.shape[1]
    y = lax.conv_general_dilated(
        x_nchw, w, window_strides=(1, 1), padding=[(1, 1), (1, 1)],
        dimension_numbers=("NCHW", "OIHW", "NCHW"),
        feature_group_count=C)
    y = y + b.reshape(1, C, 1, 1)
    y = 0.5 * y * (1.0 + lax.erf(y / math.sqrt(2.0)))
    y = (gamma.reshape(1, C, 1, 1) * (y - run_mean.reshape(1, C, 1, 1))
         / jnp.sqrt(run_var.reshape(1, C, 1, 1) + eps) + beta.reshape(1, C, 1, 1))
    return y + x_nchw


if __name__ == "__main__":
    key = jax.random.PRNGKey(0)
    N, C, H, W, K = 2, 16, 16, 16, 3

    k_x, k_w, k_b, k_g, k_bt, k_m, k_v = jax.random.split(key, 7)
    x = jax.random.normal(k_x, (N, C, H, W), jnp.float32)
    # Depthwise Conv2d(C, C, 3, groups=C): weight (C, 1, 3, 3), bias (C,)
    w = jax.random.normal(k_w, (C, 1, K, K), jnp.float32) * 0.1
    b = jax.random.normal(k_b, (C,), jnp.float32) * 0.1
    # BatchNorm2d(C) eval-mode parameters / running stats.
    gamma = 1.0 + 0.1 * jax.random.normal(k_g, (C,), jnp.float32)
    beta = 0.1 * jax.random.normal(k_bt, (C,), jnp.float32)
    run_mean = 0.1 * jax.random.normal(k_m, (C,), jnp.float32)
    run_var = jnp.abs(jax.random.normal(k_v, (C,), jnp.float32)) + 0.5

    out = residual_dwconv_block(x, w, b, gamma, beta, run_mean, run_var)
    out = jax.block_until_ready(out)

    ref = _reference(x, w, b, gamma, beta, run_mean, run_var)
    assert out.shape == (N, C, H, W)
    assert jnp.allclose(out, ref, atol=1e-4, rtol=1e-4), float(
        jnp.max(jnp.abs(out - ref)))

    print("KERNEL_OK")
</pallas_src>

<mosaic_0001>
module attributes {stable_mosaic.version = 11 : i64} {
  func.func @_residual_dwconv_kernel(%arg0: i32, %arg1: i32, %arg2: memref<1x16x256xf32, #tpu.memory_space<vmem>>, %arg3: memref<16x12xf32, #tpu.memory_space<vmem>>, %arg4: memref<1x16x256xf32, #tpu.memory_space<vmem>>) attributes {dimension_semantics = [#tpu.dimension_semantics<parallel>, #tpu.dimension_semantics<parallel>], iteration_bounds = array<i64: 1, 2>, scalar_prefetch = 0 : i64, scratch_operands = 0 : i64, tpu.core_type = #tpu.core_type<tc>, window_params = [{transform_indices = @transform_0, window_bounds = array<i64: 1, 16, 256>}, {transform_indices = @transform_1, window_bounds = array<i64: 16, 12>}, {transform_indices = @transform_2, window_bounds = array<i64: 1, 16, 256>}]} {
    %c0 = arith.constant 0 : index
    %c0_0 = arith.constant 0 : index
    %c0_1 = arith.constant 0 : index
    %0 = vector.load %arg2[%c0, %c0_0, %c0_1] : memref<1x16x256xf32, #tpu.memory_space<vmem>>, vector<1x16x256xf32>
    %1 = vector.shape_cast %0 : vector<1x16x256xf32> to vector<16x256xf32>
    %c0_2 = arith.constant 0 : index
    %c0_3 = arith.constant 0 : index
    %2 = vector.load %arg3[%c0_2, %c0_3] : memref<16x12xf32, #tpu.memory_space<vmem>>, vector<16x12xf32>
    %3 = vector.extract_strided_slice %2 {offsets = [0, 0], sizes = [16, 9], strides = [1, 1]} : vector<16x12xf32> to vector<16x9xf32>
    %4 = vector.extract_strided_slice %2 {offsets = [0, 9], sizes = [16, 1], strides = [1, 1]} : vector<16x12xf32> to vector<16x1xf32>
    %5 = vector.extract_strided_slice %2 {offsets = [0, 10], sizes = [16, 1], strides = [1, 1]} : vector<16x12xf32> to vector<16x1xf32>
    %6 = vector.extract_strided_slice %2 {offsets = [0, 11], sizes = [16, 1], strides = [1, 1]} : vector<16x12xf32> to vector<16x1xf32>
    %7 = tpu.iota {dimensions = array<i32: 1>} : vector<1x256xi32>
    %c15_i32 = arith.constant 15 : i32
    %8 = vector.broadcast %c15_i32 : i32 to vector<1x256xi32>
    %9 = arith.andi %7, %8 : vector<1x256xi32>
    %c240_i32 = arith.constant 240 : i32
    %10 = vector.broadcast %c240_i32 : i32 to vector<1x256xi32>
    %11 = arith.cmpi slt, %7, %10 : vector<1x256xi32>
    %c16_i32 = arith.constant 16 : i32
    %12 = vector.broadcast %c16_i32 : i32 to vector<1x256xi32>
    %13 = arith.cmpi sge, %7, %12 : vector<1x256xi32>
    %c15_i32_4 = arith.constant 15 : i32
    %14 = vector.broadcast %c15_i32_4 : i32 to vector<1x256xi32>
    %15 = arith.cmpi slt, %9, %14 : vector<1x256xi32>
    %c1_i32 = arith.constant 1 : i32
    %16 = vector.broadcast %c1_i32 : i32 to vector<1x256xi32>
    %17 = arith.cmpi sge, %9, %16 : vector<1x256xi32>
    %18 = arith.andi %13, %17 : vector<1x256xi1>
    %19 = arith.andi %13, %15 : vector<1x256xi1>
    %20 = arith.andi %11, %17 : vector<1x256xi1>
    %21 = arith.andi %11, %15 : vector<1x256xi1>
    %22 = vector.extract_strided_slice %3 {offsets = [0, 4], sizes = [16, 1], strides = [1, 1]} : vector<16x9xf32> to vector<16x1xf32>
    %23 = vector.broadcast %22 : vector<16x1xf32> to vector<16x256xf32>
    %24 = arith.mulf %1, %23 : vector<16x256xf32>
    %25 = vector.broadcast %4 : vector<16x1xf32> to vector<16x256xf32>
    %26 = arith.addf %24, %25 : vector<16x256xf32>
    %c17_i32 = arith.constant 17 : i32
    %27 = tpu.dynamic_rotate %1 by %c17_i32 dim 1 : vector<16x256xf32>, i32 -> vector<16x256xf32>
    %cst = arith.constant 0.000000e+00 : f32
    %28 = vector.shape_cast %18 : vector<1x256xi1> to vector<1x256xi1>
    %29 = vector.broadcast %28 : vector<1x256xi1> to vector<16x256xi1>
    %30 = vector.broadcast %cst : f32 to vector<16x256xf32>
    %31 = arith.select %29, %27, %30 : vector<16x256xi1>, vector<16x256xf32>
    %32 = vector.extract_strided_slice %3 {offsets = [0, 0], sizes = [16, 1], strides = [1, 1]} : vector<16x9xf32> to vector<16x1xf32>
    %33 = vector.broadcast %32 : vector<16x1xf32> to vector<16x256xf32>
    %34 = arith.mulf %31, %33 : vector<16x256xf32>
    %35 = arith.addf %26, %34 : vector<16x256xf32>
    %c16_i32_5 = arith.constant 16 : i32
    %36 = tpu.dynamic_rotate %1 by %c16_i32_5 dim 1 : vector<16x256xf32>, i32 -> vector<16x256xf32>
    %cst_6 = arith.constant 0.000000e+00 : f32
    %37 = vector.shape_cast %13 : vector<1x256xi1> to vector<1x256xi1>
    %38 = vector.broadcast %37 : vector<1x256xi1> to vector<16x256xi1>
    %39 = vector.broadcast %cst_6 : f32 to vector<16x256xf32>
    %40 = arith.select %38, %36, %39 : vector<16x256xi1>, vector<16x256xf32>
    %41 = vector.extract_strided_slice %3 {offsets = [0, 1], sizes = [16, 1], strides = [1, 1]} : vector<16x9xf32> to vector<16x1xf32>
    %42 = vector.broadcast %41 : vector<16x1xf32> to vector<16x256xf32>
    %43 = arith.mulf %40, %42 : vector<16x256xf32>
    %44 = arith.addf %35, %43 : vector<16x256xf32>
    %c15_i32_7 = arith.constant 15 : i32
    %45 = tpu.dynamic_rotate %1 by %c15_i32_7 dim 1 : vector<16x256xf32>, i32 -> vector<16x256xf32>
    %cst_8 = arith.constant 0.000000e+00 : f32
    %46 = vector.shape_cast %19 : vector<1x256xi1> to vector<1x256xi1>
    %47 = vector.broadcast %46 : vector<1x256xi1> to vector<16x256xi1>
    %48 = vector.broadcast %cst_8 : f32 to vector<16x256xf32>
    %49 = arith.select %47, %45, %48 : vector<16x256xi1>, vector<16x256xf32>
    %50 = vector.extract_strided_slice %3 {offsets = [0, 2], sizes = [16, 1], strides = [1, 1]} : vector<16x9xf32> to vector<16x1xf32>
    %51 = vector.broadcast %50 : vector<16x1xf32> to vector<16x256xf32>
    %52 = arith.mulf %49, %51 : vector<16x256xf32>
    %53 = arith.addf %44, %52 : vector<16x256xf32>
    %c1_i32_9 = arith.constant 1 : i32
    %54 = tpu.dynamic_rotate %1 by %c1_i32_9 dim 1 : vector<16x256xf32>, i32 -> vector<16x256xf32>
    %cst_10 = arith.constant 0.000000e+00 : f32
    %55 = vector.shape_cast %17 : vector<1x256xi1> to vector<1x256xi1>
    %56 = vector.broadcast %55 : vector<1x256xi1> to vector<16x256xi1>
    %57 = vector.broadcast %cst_10 : f32 to vector<16x256xf32>
    %58 = arith.select %56, %54, %57 : vector<16x256xi1>, vector<16x256xf32>
    %59 = vector.extract_strided_slice %3 {offsets = [0, 3], sizes = [16, 1], strides = [1, 1]} : vector<16x9xf32> to vector<16x1xf32>
    %60 = vector.broadcast %59 : vector<16x1xf32> to vector<16x256xf32>
    %61 = arith.mulf %58, %60 : vector<16x256xf32>
    %62 = arith.addf %53, %61 : vector<16x256xf32>
    %c255_i32 = arith.constant 255 : i32
    %63 = tpu.dynamic_rotate %1 by %c255_i32 dim 1 : vector<16x256xf32>, i32 -> vector<16x256xf32>
    %cst_11 = arith.constant 0.000000e+00 : f32
    %64 = vector.shape_cast %15 : vector<1x256xi1> to vector<1x256xi1>
    %65 = vector.broadcast %64 : vector<1x256xi1> to vector<16x256xi1>
    %66 = vector.broadcast %cst_11 : f32 to vector<16x256xf32>
    %67 = arith.select %65, %63, %66 : vector<16x256xi1>, vector<16x256xf32>
    %68 = vector.extract_strided_slice %3 {offsets = [0, 5], sizes = [16, 1], strides = [1, 1]} : vector<16x9xf32> to vector<16x1xf32>
    %69 = vector.broadcast %68 : vector<16x1xf32> to vector<16x256xf32>
    %70 = arith.mulf %67, %69 : vector<16x256xf32>
    %71 = arith.addf %62, %70 : vector<16x256xf32>
    %c241_i32 = arith.constant 241 : i32
    %72 = tpu.dynamic_rotate %1 by %c241_i32 dim 1 : vector<16x256xf32>, i32 -> vector<16x256xf32>
    %cst_12 = arith.constant 0.000000e+00 : f32
    %73 = vector.shape_cast %20 : vector<1x256xi1> to vector<1x256xi1>
    %74 = vector.broadcast %73 : vector<1x256xi1> to vector<16x256xi1>
    %75 = vector.broadcast %cst_12 : f32 to vector<16x256xf32>
    %76 = arith.select %74, %72, %75 : vector<16x256xi1>, vector<16x256xf32>
    %77 = vector.extract_strided_slice %3 {offsets = [0, 6], sizes = [16, 1], strides = [1, 1]} : vector<16x9xf32> to vector<16x1xf32>
    %78 = vector.broadcast %77 : vector<16x1xf32> to vector<16x256xf32>
    %79 = arith.mulf %76, %78 : vector<16x256xf32>
    %80 = arith.addf %71, %79 : vector<16x256xf32>
    %c240_i32_13 = arith.constant 240 : i32
    %81 = tpu.dynamic_rotate %1 by %c240_i32_13 dim 1 : vector<16x256xf32>, i32 -> vector<16x256xf32>
    %cst_14 = arith.constant 0.000000e+00 : f32
    %82 = vector.shape_cast %11 : vector<1x256xi1> to vector<1x256xi1>
    %83 = vector.broadcast %82 : vector<1x256xi1> to vector<16x256xi1>
    %84 = vector.broadcast %cst_14 : f32 to vector<16x256xf32>
    %85 = arith.select %83, %81, %84 : vector<16x256xi1>, vector<16x256xf32>
    %86 = vector.extract_strided_slice %3 {offsets = [0, 7], sizes = [16, 1], strides = [1, 1]} : vector<16x9xf32> to vector<16x1xf32>
    %87 = vector.broadcast %86 : vector<16x1xf32> to vector<16x256xf32>
    %88 = arith.mulf %85, %87 : vector<16x256xf32>
    %89 = arith.addf %80, %88 : vector<16x256xf32>
    %c239_i32 = arith.constant 239 : i32
    %90 = tpu.dynamic_rotate %1 by %c239_i32 dim 1 : vector<16x256xf32>, i32 -> vector<16x256xf32>
    %cst_15 = arith.constant 0.000000e+00 : f32
    %91 = vector.shape_cast %21 : vector<1x256xi1> to vector<1x256xi1>
    %92 = vector.broadcast %91 : vector<1x256xi1> to vector<16x256xi1>
    %93 = vector.broadcast %cst_15 : f32 to vector<16x256xf32>
    %94 = arith.select %92, %90, %93 : vector<16x256xi1>, vector<16x256xf32>
    %95 = vector.extract_strided_slice %3 {offsets = [0, 8], sizes = [16, 1], strides = [1, 1]} : vector<16x9xf32> to vector<16x1xf32>
    %96 = vector.broadcast %95 : vector<16x1xf32> to vector<16x256xf32>
    %97 = arith.mulf %94, %96 : vector<16x256xf32>
    %98 = arith.addf %89, %97 : vector<16x256xf32>
    %cst_16 = arith.constant 5.000000e-01 : f32
    %99 = vector.broadcast %cst_16 : f32 to vector<16x256xf32>
    %100 = arith.mulf %99, %98 : vector<16x256xf32>
    %cst_17 = arith.constant 0.707106769 : f32
    %101 = vector.broadcast %cst_17 : f32 to vector<16x256xf32>
    %102 = arith.mulf %98, %101 : vector<16x256xf32>
    %103 = math.erf %102 : vector<16x256xf32>
    %cst_18 = arith.constant 1.000000e+00 : f32
    %104 = vector.broadcast %cst_18 : f32 to vector<16x256xf32>
    %105 = arith.addf %104, %103 : vector<16x256xf32>
    %106 = arith.mulf %100, %105 : vector<16x256xf32>
    %107 = vector.broadcast %5 : vector<16x1xf32> to vector<16x256xf32>
    %108 = arith.mulf %106, %107 : vector<16x256xf32>
    %109 = vector.broadcast %6 : vector<16x1xf32> to vector<16x256xf32>
    %110 = arith.addf %108, %109 : vector<16x256xf32>
    %111 = arith.addf %110, %1 : vector<16x256xf32>
    %c0_19 = arith.constant 0 : index
    %c0_20 = arith.constant 0 : index
    %c0_21 = arith.constant 0 : index
    %112 = vector.load %arg4[%c0_19, %c0_20, %c0_21] : memref<1x16x256xf32, #tpu.memory_space<vmem>>, vector<1x16x256xf32>
    %113 = vector.shape_cast %112 : vector<1x16x256xf32> to vector<16x256xf32>
    %114 = vector.shape_cast %111 : vector<16x256xf32> to vector<1x16x256xf32>
    tpu.vector_store %arg4[%c0_19, %c0_20, %c0_21], %114 {strides = array<i32>} : memref<1x16x256xf32, #tpu.memory_space<vmem>>, vector<1x16x256xf32>,
    return
  }
  func.func @transform_0(%arg0: i32, %arg1: i32) -> (i32, i32, i32) {
    %c0_i32 = arith.constant 0 : i32
    %c0_i32_0 = arith.constant 0 : i32
    return %arg1, %arg0, %c0_i32 : i32, i32, i32
  }
  func.func @transform_1(%arg0: i32, %arg1: i32) -> (i32, i32) {
    %c0_i32 = arith.constant 0 : i32
    %c0_i32_0 = arith.constant 0 : i32
    return %arg0, %c0_i32 : i32, i32
  }
  func.func @transform_2(%arg0: i32, %arg1: i32) -> (i32, i32, i32) {
    %c0_i32 = arith.constant 0 : i32
    %c0_i32_0 = arith.constant 0 : i32
    return %arg1, %arg0, %c0_i32 : i32, i32, i32
  }
}

</mosaic_0001>

<bundles_post_ra>
// kernel: tpu_custom_call.1
= control target key start
LH: loop header
LB: loop body
LE: loop exit
PB: predicated region body
PF: predicated region fallthrough
CT: control target
= control target key end

     0   :  { %7 = vsyncpa [#allocation3], 0  ;;  %s1760_s0 = inlined_call_operand.hbm [shape: f32[2,16,256], index: 0, kind: input, shape index: {}]   ;;  %s1761_s1 = inlined_call_operand.hbm [shape: f32[16,12], index: 1, kind: input, shape index: {}]   ;;  %s1762_s2 = inlined_call_operand.hbm [shape: f32[2,16,256], index: 2, kind: output, shape index: {}]  }
   0x1   :  { %9 = vsyncpa [#allocation3 + $0x1], 0 }
   0x2   :  { %10 = vsyncpa [#allocation6], 0 }
   0x3   :  { %11 = vsyncpa [#allocation4], 0 }
   0x4   :  { %13 = vsyncpa [#allocation4 + $0x1], 0  ;;  %s1227_s9 = smov 0   ;;  %s1229_s10 = smov 0  }
   0x5   :  { %s1231_s11 = smov 0   ;;  %s1233_s12 = smov 0  }
   0x6   :  { %s1235_s13 = smov 0   ;;  %s1237_s14 = smov 0  }
   0x7 LB: > { %s886_s15 = sadd.s32 4294967295, %s1184_s14   ;;  %s887_s16 = sadd.s32 4294967294, %s1184_s14   ;;  %s1184_s14 = sphi %s1237_s14, %s19_s14   ;;  %s1180_s13 = sphi %s1235_s13, %s1788_s13   ;;  %s1176_s12 = sphi %s1233_s12, %s1787_s12   ;;  %s1172_s11 = sphi %s1231_s11, %s1786_s11   ;;  %s1168_s10 = sphi %s1229_s10, %s1785_s10   ;;  %s1164_s9 = sphi %s1227_s9, %s1784_s9  }
   0x8   : > { %p53_p0 = scmp.ne.s32.totalorder %s1168_s10, %s1164_s9  ;;  %p1261_p1 = scmp.eq.s32.totalorder %s886_s15, 0 }
   0x9   : > { %p1265_p2 = scmp.eq.s32.totalorder %s886_s15, 1  ;;  %p111_p3 = scmp.eq.s32.totalorder %s887_s16, 1 }
   0xa   : > { %p1271_p4 = por %p1261_p1, %p53_p0  ;;  %p888_p5 = scmp.ge.s32.totalorder %s1184_s14, 1 }
   0xb   : > { %p1276_p6 = por %p111_p3, %p53_p0  ;;  %p118_p7 = scmp.lt.s32.totalorder %s1184_s14, 3 }
   0xc   : > { %s132_s23 = sshll.u32 %s1761_s1, 4  ;;  %s1186_s25 = smov [#allocation5]   ;;  %s133_s23 = int_to_ptr.hbm [resolvable:$true] %s132_s23 }
   0xd   : > { %p1284_p8 = pnand %p888_p5, %p118_p7  ;;  %s134_s26 = sshll.u32 %s1186_s25, 4  ;;  %s135_s26 = int_to_ptr.vmem [resolvable:$true] %s134_s26 }
   0xe   : > { %p890_p11 = scmp.ge.s32.totalorder %s1184_s14, 2  ;;  %s1187_s27 = smov 128  }
   0xf   : > { %p917_p9 = pneg %p1284_p8  ;;  %s1188_s28 = smov 8  }
  0x10   : > { %s28_s29 = sadd.s32 1, %s1180_s13  ;;  %s40_s30 = sadd.s32 1, %s1172_s11 }
  0x11   : > { %p918_p10 = pnand %p917_p9, %p1261_p1  ;;  %p29_p12 = scmp.ge.s32.totalorder %s28_s29, 2 }
  0x12   : > { %p47_p13 = scmp.ne.s32.totalorder %s1172_s11, %s1168_s10  ;;  %p48_p0 = scmp.eq.s32.totalorder %s1184_s14, 0 }
  0x13   : > { %920 = dma.hbm_to_vmem [thread:$0]  (!%p918_p10), %s133_s23, 256, %s135_s26, [#allocation6], %s1187_s27, %s1187_s27, %s1188_s28  }
  0x14   : > { %s1790_s29 = smov (%p29_p12, %s28_s29), 0  ;;  %p1300_p3 = por %p48_p0, %p47_p13 }
  0x15   : > { %p1306_p5 = por %p1265_p2, %p47_p13  ;;  %s35_s5 = ssub.s32 %s1180_s13, %s1790_s29 }
  0x16   : > { %p930_p7 = scmp.lt.s32.totalorder %s1184_s14, 2  ;;  %p38_p9 = scmp.eq.s32.totalorder %s35_s5, 0 }
  0x17   : > { %s148_s6 = sand.u32 1, %s1172_s11   ;;  %s907_s15 = sshll.u32 %s1180_s13, 5 }
  0x18   : > { %s891_s7 = sshll.u32 %s148_s6, 5  ;;  %s160_s22 = scalar_lea.hbm %s1760_s0, %s907_s15 }
  0x19   : > { %s1315_s8 = scalar_select %p38_p9, %s1172_s11, %s40_s30  }
  0x1a   : > { %s152_s23 = scalar_lea.vmem [#allocation2], %s891_s7  ;;  %s161_s18 = sshll.u32 %s160_s22, 4  ;;  %s162_s18 = int_to_ptr.hbm [resolvable:$true] %s161_s18 }
  0x1b   : > { %s163_s25 = sshll.u32 %s152_s23, 4  ;;  %p922_p2 = pnand %p930_p7, %p1300_p3  ;;  %s164_s25 = int_to_ptr.vmem [resolvable:$true] %s163_s25 }
  0x1c   : > { %s149_s26 = scalar_lea.sflag [#allocation3], %s148_s6  ;;  %s1189_s27 = smov 256  }
  0x1d   : > { %s1190_s28 = smov 16   ;;  %175 = sbr.rel (%p1284_p8) target bundleno = 357 (0x165), region = 28 }
  0x1e   : > { %924 = dma.hbm_to_vmem [thread:$0]  (!%p922_p2), %s162_s18, 512, %s164_s25, %s149_s26, %s1189_s27, %s1189_s27, %s1190_s28  }
  0x1f   : > { %s1326_s30 = sand.u32 (!%p1284_p8), 1, %s1168_s10  }
  0x20   : > { %s895_s5 = sshll.u32 (!%p1284_p8), %s1326_s30, 5  ;;  %s178_s7 = scalar_lea.sflag (!%p1284_p8), [#allocation3], %s1326_s30 }
  0x21   : > { %s181_s15 = scalar_lea.vmem (!%p1284_p8), [#allocation2], %s895_s5 }
  0x22   : > { %1151 = dma.done.wait (%p1271_p4), %s178_s7, 512  }
  0x23   : > { %1153 = vsyncadd (%p1271_p4), %s178_s7, 4294966784 }
  0x24   : > { %1155 = dma.done.wait (%p1261_p1), [#allocation6], 256  }
  0x25   : > { %1157 = vsyncadd (%p1261_p1), [#allocation6], 4294967040  ;;  %v1191_v0 = vmov 9   ;;  %v1192_v1 = vmov 4   ;;  %v1193_v2 = vmov 0   ;;  %v1340_v3 = vld [vmem:[#allocation5] sm:$0xff]  ;;  %v217_v18 = vlaneseq }
  0x26   : > { %1008 = vset.pattern.permute.xlu1 %v1191_v0  ;;  %1007 = vset.pattern.permute.xlu0 %v1192_v1  ;;  %v1344_v4 = vld [vmem:[%s181_s15] sm:$0xff]  ;;  %s1194_s19 = smov 17   ;;  %v1347_v5 = vld [vmem:[#allocation5 + $0x8] sm:$0xff]  ;;  %v1349_v6 = vld [vmem:[%s181_s15 + $0x10] sm:$0xff]  ;;  %v1195_v9 = vmov 1   ;;  %s1196_s17 = smov 16  }
  0x27   : > { %1009 = vset.pattern.permute.xlu2 %v1193_v2  ;;  %253 = vperm.xlu1 %1008, %v1340_v3   ;;  %v1354_v7 = vld [vmem:[%s181_s15 + $0x18] sm:$0xff]  ;;  %v1356_v8 = vld [vmem:[%s181_s15 + $0x8] sm:$0xff]  ;;  %v1197_v10 = vmov 2   ;;  %s1198_s24 = smov 15   ;;  %s1199_s3 = smov 1   ;;  %v1200_v11 = vmov 3  }
  0x28   : > { %240 = vperm.xlu0 %1007, %v1340_v3   ;;  %264 = vrot.lane.b32.xlu2 %v1344_v4, %s1194_s19  ;;  %s1201_s6 = smov 127   ;;  %v1202_v12 = vmov 5   ;;  %s1203_s16 = smov 113   ;;  %v1204_v14 = vmov 6   ;;  %v1206_v17 = vmov 7   ;;  %v1404_v26 = vand.u32 127, %v217_v18 }
  0x29   : > { %s1205_s21 = smov 112   ;;  %s1207_s22 = smov 111   ;;  %v1208_v42 = vmov 8  }
  0x2a   : > { %v1410_v27 = vadd.s32 128, %v1404_v26  ;;  %vm309_vm0 = vcmp.lt.s32.totalorder %v1404_v26, 16  ;;  %v220_v30 = vand.u32 15, %v1404_v26  ;;  %vm224_vm1 = vcmp.ge.s32.totalorder %v1404_v26, 16  ;;  %s207_s23 = scalar_lea.vmem [#allocation7], %s895_s5  ;;  %s908_s25 = sshll.u32 %s1176_s12, 5 }
  0x2b   : > { %vm272_vm3 = vcmp.lt.s32.totalorder %v1404_v26, 17  ;;  %vm346_vm6 = vcmp.lt.s32.totalorder %v1404_v26, 15  ;;  %vm383_vm8 = vcmp.lt.s32.totalorder %v1404_v26, 1  ;;  %vm420_vm11 = vcmp.lt.s32.totalorder %v1404_v26, 127  ;;  %s783_s27 = scalar_lea.hbm %s1762_s2, %s908_s25  ;;  %s784_s28 = sshll.u32 %s207_s23, 4  ;;  %s785_s28 = int_to_ptr.vmem [resolvable:$true] %s784_s28 }
  0x2c   : > { %v221_v38 = vand.u32 15, %v1410_v27  ;;  %vm1427_vm2 = vcmp.ge.s32.totalorder %v220_v30, 1  ;;  %vm1480_vm7 = vcmp.lt.s32.totalorder %v220_v30, 15  ;;  %vm457_vm12 = vcmp.lt.s32.totalorder %v1404_v26, 113  ;;  %s786_s5 = sshll.u32 %s783_s27, 4  ;;  %s769_s12 = scalar_lea.sflag [#allocation4], %s1326_s30  ;;  %s787_s5 = int_to_ptr.hbm [resolvable:$true] %s786_s5 }
  0x2d   : > { %vm1444_vm5 = vmand %vm224_vm1, %vm1427_vm2  ;;  %vm223_vm13 = vcmp.lt.s32.totalorder %v1410_v27, 240  ;;  %vm494_vm14 = vcmp.lt.s32.totalorder %v1404_v26, 112  ;;  %s1112_s7 = sshra.s32 %s787_s5, 4  ;;  %s1113_s7 = int_to_ptr.hbm [resolvable:$true] %s1112_s7 }
  0x2e   : > { %vm1436_vm4 = vcmp.ge.s32.totalorder %v221_v38, 1  ;;  %vm1491_vm9 = vcmp.lt.s32.totalorder %v221_v38, 15  ;;  %vm232_vm10 = vmand %vm224_vm1, %vm1480_vm7  ;;  %s1114_s15 = scalar_lea.hbm %s1113_s7, 32  ;;  %p1119_p10 = scmp.lt.s32.totalorder %s1113_s7, %s1762_s2 }
  0x2f   : > { %257 = vperm.xlu1 %1008, %v1347_v5   ;;  %vm1551_vm15 = vmand %vm223_vm13, %vm1436_vm4  ;;  %p1115_p1 = scmp.ne.s32.totalorder %s1113_s7, %s1114_s15 }
  0x30   : > { %245 = vperm.xlu0 %1007, %v1347_v5   ;;  %266 = vrot.lane.b32.xlu2 %v1349_v6, %s1194_s19 }
  0x31   : > { %p1116_p4 = pnand %p1115_p1, %p1306_p5 }
  0x33   : > { %p1117_p8 = pneg %p1116_p4 }
  0x37   : > { %270 = vrot.lane.b32.xlu1 %v1354_v7, %s1194_s19 }
  0x38   : > { %268 = vrot.lane.b32.xlu0 %v1356_v8, %s1194_s19  ;;  %286 = vperm.xlu2 %1009, %v1340_v3  }
  0x39   : > { %1010 = vset.pattern.permute.xlu0 %v1193_v2  ;;  %1012 = vset.pattern.permute.xlu1 %v1195_v9 }
  0x3f   : > { %301 = vrot.lane.b32.xlu1 %v1344_v4, %s1196_s17 }
  0x40   : > { %290 = vperm.xlu0 %1010, %v1347_v5   ;;  %303 = vrot.lane.b32.xlu2 %v1349_v6, %s1196_s17 }
  0x41   : > { %1014 = vset.pattern.permute.xlu2 %v1197_v10 }
  0x47   : > { %305 = vrot.lane.b32.xlu1 %v1356_v8, %s1196_s17 }
  0x48   : > { %1011 = vset.pattern.permute.xlu0 %v1195_v9  ;;  %307 = vrot.lane.b32.xlu2 %v1354_v7, %s1196_s17  ;;  %v1209_v9 = vmov 10  }
  0x49   : > { %323 = vperm.xlu0 %1011, %v1340_v3  }
  0x4f   : > { %327 = vperm.xlu1 %1012, %v1347_v5  }
  0x50   : > { %338 = vrot.lane.b32.xlu2 %v1344_v4, %s1198_s24 }
  0x51   : > { %344 = vrot.lane.b32.xlu0 %v1354_v7, %s1198_s24 }
  0x52   : > { %1025 = vset.pattern.permute.xlu0 %v1209_v9 }
  0x57   : > { %340 = vrot.lane.b32.xlu1 %v1349_v6, %s1198_s24 }
  0x58   : > { %1013 = vset.pattern.permute.xlu1 %v1197_v10  ;;  %342 = vrot.lane.b32.xlu2 %v1356_v8, %s1198_s24 }
  0x59   : > { %375 = vrot.lane.b32.xlu0 %v1344_v4, %s1199_s3 }
  0x5f   : > { %360 = vperm.xlu1 %1013, %v1340_v3  }
  0x60   : > { %364 = vperm.xlu2 %1014, %v1347_v5  }
  0x61   : > { %381 = vrot.lane.b32.xlu0 %v1354_v7, %s1199_s3 }
  0x67   : > { %377 = vrot.lane.b32.xlu1 %v1349_v6, %s1199_s3 }
  0x68   : > { %1015 = vset.pattern.permute.xlu1 %v1200_v11  ;;  %379 = vrot.lane.b32.xlu2 %v1356_v8, %s1199_s3  ;;  %s1118_s3 = scalar_lea.hbm %s1762_s2, 64 }
  0x69   : > { %412 = vrot.lane.b32.xlu0 %v1344_v4, %s1201_s6  ;;  %1016 = vset.pattern.permute.xlu2 %v1200_v11  ;;  %p1120_p12 = scmp.lt.s32.totalorder %s1118_s3, %s1114_s15 }
  0x6b   : > { %p1121_p13 = por %p1120_p12, %p1119_p10 }
  0x6d   : > { %p1122_p0 = pnand %p1121_p13, %p1117_p8 }
  0x6f   : > { %397 = vperm.xlu1 %1015, %v1340_v3  }
  0x70   : > { %401 = vperm.xlu2 %1016, %v1347_v5  }
  0x71   : > { %418 = vrot.lane.b32.xlu0 %v1354_v7, %s1201_s6 }
  0x77   : > { %414 = vrot.lane.b32.xlu1 %v1349_v6, %s1201_s6 }
  0x78   : > { %1017 = vset.pattern.permute.xlu1 %v1202_v12  ;;  %416 = vrot.lane.b32.xlu2 %v1356_v8, %s1201_s6 }
  0x79   : > { %449 = vrot.lane.b32.xlu0 %v1344_v4, %s1203_s16  ;;  %1018 = vset.pattern.permute.xlu2 %v1202_v12 }
  0x7f   : > { %434 = vperm.xlu1 %1017, %v1340_v3  }
  0x80   : > { %438 = vperm.xlu2 %1018, %v1347_v5  }
  0x81   : > { %455 = vrot.lane.b32.xlu0 %v1354_v7, %s1203_s16 }
  0x82   : > { %v265_v13 = vpop.permute.xlu2 %264 }
  0x87   : > { %451 = vrot.lane.b32.xlu1 %v1349_v6, %s1203_s16 }
  0x88   : > { %1019 = vset.pattern.permute.xlu1 %v1204_v14  ;;  %453 = vrot.lane.b32.xlu2 %v1356_v8, %s1203_s16 }
  0x89   : > { %486 = vrot.lane.b32.xlu0 %v1344_v4, %s1205_s21  ;;  %1020 = vset.pattern.permute.xlu2 %v1204_v14 }
  0x8a   : > { %v267_v15 = vpop.permute.xlu2 %266 }
  0x8f   : > { %471 = vperm.xlu1 %1019, %v1340_v3  }
  0x90   : > { %475 = vperm.xlu2 %1020, %v1347_v5  }
  0x91   : > { %492 = vrot.lane.b32.xlu0 %v1354_v7, %s1205_s21 }
  0x92   : > { %v287_v16 = vpop.permute.xlu2 %286 }
  0x97   : > { %488 = vrot.lane.b32.xlu1 %v1349_v6, %s1205_s21 }
  0x98   : > { %1021 = vset.pattern.permute.xlu1 %v1206_v17  ;;  %490 = vrot.lane.b32.xlu2 %v1356_v8, %s1205_s21 }
  0x99   : > { %523 = vrot.lane.b32.xlu0 %v1344_v4, %s1207_s22  ;;  %v254_v19 = vpop.permute.xlu1 %253  ;;  %1022 = vset.pattern.permute.xlu2 %v1206_v17 }
  0x9a   : > { %v241_v20 = vpop.permute.xlu0 %240  ;;  %v304_v23 = vpop.permute.xlu2 %303 }
  0x9b   : > { %v248_v21 = vmul.f32 %v241_v20, %v1344_v4  ;;  %v249_v22 = vmul.f32 %v241_v20, %v1356_v8  ;;  %v1210_v20 = vmov 11  }
  0x9d   : > { %v260_v24 = vadd.f32 %v254_v19, %v248_v21  ;;  %v261_v25 = vadd.f32 %v254_v19, %v249_v22 }
  0x9f   : > { %508 = vperm.xlu1 %1021, %v1340_v3  }
  0xa0   : > { %512 = vperm.xlu2 %1022, %v1347_v5  }
  0xa1   : > { %529 = vrot.lane.b32.xlu0 %v1354_v7, %s1207_s22  ;;  %v258_v28 = vpop.permute.xlu1 %257 }
  0xa2   : > { %v246_v29 = vpop.permute.xlu0 %245  ;;  %v308_v33 = vpop.permute.xlu2 %307 }
  0xa3   : > { %v250_v31 = vmul.f32 %v246_v29, %v1349_v6  ;;  %v251_v32 = vmul.f32 %v246_v29, %v1354_v7  ;;  %v1419_v34 = vsel %vm309_vm0, %v304_v23, %v308_v33  ;;  %v313_v35 = vsel %vm309_vm0, %v308_v33, %v304_v23 }
  0xa4   : > { %v320_v22 = vsel %vm224_vm1, %v313_v35, 0.0 }
  0xa5   : > { %v262_v36 = vadd.f32 %v258_v28, %v250_v31  ;;  %v263_v37 = vadd.f32 %v258_v28, %v251_v32 }
  0xa7   : > { %525 = vrot.lane.b32.xlu1 %v1349_v6, %s1207_s22 }
  0xa8   : > { %1023 = vset.pattern.permute.xlu1 %v1208_v42  ;;  %527 = vrot.lane.b32.xlu2 %v1356_v8, %s1207_s22 }
  0xa9   : > { %v271_v43 = vpop.permute.xlu1 %270  ;;  %1024 = vset.pattern.permute.xlu2 %v1208_v42  ;;  %737 = vperm.xlu0 %1025, %v1340_v3  }
  0xaa   : > { %v269_v44 = vpop.permute.xlu0 %268  ;;  %v274_v45 = vsel %vm272_vm3, %v267_v15, %v271_v43  ;;  %v276_v46 = vsel %vm272_vm3, %v271_v43, %v267_v15  ;;  %v339_v49 = vpop.permute.xlu2 %338 }
  0xab   : > { %v273_v47 = vsel %vm272_vm3, %v265_v13, %v269_v44  ;;  %v275_v48 = vsel %vm272_vm3, %v269_v44, %v265_v13  ;;  %v283_v57 = vsel %vm1444_vm5, %v276_v46, 0.0  ;;  %v284_v58 = vsel %vm1436_vm4, %v274_v45, 0.0 }
  0xac   : > { %v281_v50 = vsel %vm1444_vm5, %v275_v48, 0.0  ;;  %v282_v51 = vsel %vm1436_vm4, %v273_v47, 0.0 }
  0xad   : > { %v293_v52 = vmul.f32 %v287_v16, %v281_v50  ;;  %v294_v53 = vmul.f32 %v287_v16, %v282_v51 }
  0xaf   : > { %v297_v54 = vadd.f32 %v293_v52, %v260_v24  ;;  %v298_v55 = vadd.f32 %v294_v53, %v261_v25  ;;  %545 = vperm.xlu1 %1023, %v1340_v3  }
  0xb0   : > { %549 = vperm.xlu2 %1024, %v1347_v5  }
  0xb1   : > { %v302_v59 = vpop.permute.xlu1 %301  ;;  %1029 = vset.pattern.permute.xlu0 %v1210_v20 }
  0xb2   : > { %v291_v56 = vpop.permute.xlu0 %290  ;;  %v343_v62 = vpop.permute.xlu2 %342 }
  0xb3   : > { %v295_v60 = vmul.f32 %v291_v56, %v283_v57  ;;  %v296_v61 = vmul.f32 %v291_v56, %v284_v58  ;;  %v347_v1 = vsel %vm346_vm6, %v339_v49, %v343_v62  ;;  %v349_v2 = vsel %vm346_vm6, %v343_v62, %v339_v49 }
  0xb4   : > { %v355_v47 = vsel %vm232_vm10, %v349_v2, 0.0  ;;  %v356_v48 = vsel %vm1491_vm9, %v347_v1, 0.0 }
  0xb5   : > { %v299_v63 = vadd.f32 %v295_v60, %v262_v36  ;;  %v300_v0 = vadd.f32 %v296_v61, %v263_v37 }
  0xb7   : > { %1026 = vset.pattern.permute.xlu1 %v1209_v9 }
  0xb8   : > { %741 = vperm.xlu1 %1026, %v1347_v5   ;;  %1027 = vset.pattern.permute.xlu2 %v1210_v20 }
  0xb9   : > { %v306_v10 = vpop.permute.xlu1 %305  ;;  %749 = vperm.xlu2 %1027, %v1340_v3  }
  0xba   : > { %v310_v11 = vsel %vm309_vm0, %v302_v59, %v306_v10  ;;  %v312_v12 = vsel %vm309_vm0, %v306_v10, %v302_v59  ;;  %v365_v16 = vpop.permute.xlu2 %364  ;;  %vm531_vm0 = vcmp.lt.s32.totalorder %v1404_v26, 111 }
  0xbb   : > { %v324_v13 = vpop.permute.xlu0 %323  ;;  %v318_v14 = vsel %vm224_vm1, %v312_v12, 0.0  ;;  %vm1596_vm1 = vmand %vm223_vm13, %vm1491_vm9 }
  0xbc   : > { %v331_v15 = vmul.f32 %v324_v13, %v310_v11  ;;  %v330_v17 = vmul.f32 %v324_v13, %v318_v14 }
  0xbe   : > { %v335_v18 = vadd.f32 %v331_v15, %v298_v55  ;;  %v334_v19 = vadd.f32 %v330_v17, %v297_v54 }
  0xc0   : > { %1028 = vset.pattern.permute.xlu1 %v1210_v20 }
  0xc1   : > { %v328_v21 = vpop.permute.xlu1 %327  ;;  %753 = vperm.xlu1 %1028, %v1347_v5  }
  0xc2   : > { %v332_v23 = vmul.f32 %v328_v21, %v320_v22  ;;  %v333_v24 = vmul.f32 %v328_v21, %v1419_v34  ;;  %v380_v28 = vpop.permute.xlu2 %379 }
  0xc3   : > { %v345_v25 = vpop.permute.xlu0 %344 }
  0xc4   : > { %v336_v29 = vadd.f32 %v332_v23, %v299_v63  ;;  %v337_v31 = vadd.f32 %v333_v24, %v300_v0 }
  0xc9   : > { %v341_v3 = vpop.permute.xlu1 %340 }
  0xca   : > { %v348_v33 = vsel %vm346_vm6, %v341_v3, %v345_v25  ;;  %v350_v5 = vsel %vm346_vm6, %v345_v25, %v341_v3  ;;  %v402_v38 = vpop.permute.xlu2 %401 }
  0xcb   : > { %v376_v30 = vpop.permute.xlu0 %375  ;;  %v357_v35 = vsel %vm232_vm10, %v350_v5, 0.0  ;;  %v358_v36 = vsel %vm1491_vm9, %v348_v33, 0.0 }
  0xcc   : > { %v384_v37 = vsel %vm383_vm8, %v376_v30, %v380_v28  ;;  %v386_v41 = vsel %vm383_vm8, %v380_v28, %v376_v30  ;;  %v369_v42 = vmul.f32 %v365_v16, %v357_v35  ;;  %v370_v43 = vmul.f32 %v365_v16, %v358_v36 }
  0xcd   : > { %v392_v59 = vsel %vm1427_vm2, %v386_v41, 0.0  ;;  %v393_v60 = vsel %vm1436_vm4, %v384_v37, 0.0 }
  0xce   : > { %v1505_v44 = vadd.f32 %v369_v42, %v336_v29  ;;  %v1507_v45 = vadd.f32 %v370_v43, %v337_v31 }
  0xd1   : > { %v361_v46 = vpop.permute.xlu1 %360 }
  0xd2   : > { %v367_v49 = vmul.f32 %v361_v46, %v355_v47  ;;  %v368_v50 = vmul.f32 %v361_v46, %v356_v48  ;;  %v417_v52 = vpop.permute.xlu2 %416 }
  0xd3   : > { %v382_v51 = vpop.permute.xlu0 %381 }
  0xd4   : > { %v371_v53 = vadd.f32 %v367_v49, %v334_v19  ;;  %v372_v54 = vadd.f32 %v368_v50, %v335_v18 }
  0xd9   : > { %v378_v55 = vpop.permute.xlu1 %377 }
  0xda   : > { %v439_v57 = vpop.permute.xlu2 %438  ;;  %v387_v21 = vsel %vm383_vm8, %v382_v51, %v378_v55  ;;  %v385_v22 = vsel %vm383_vm8, %v378_v55, %v382_v51 }
  0xdb   : > { %v413_v56 = vpop.permute.xlu0 %412  ;;  %v394_v25 = vsel %vm1427_vm2, %v387_v21, 0.0  ;;  %v395_v29 = vsel %vm1436_vm4, %v385_v22, 0.0 }
  0xdc   : > { %v406_v30 = vmul.f32 %v402_v38, %v394_v25  ;;  %v407_v37 = vmul.f32 %v402_v38, %v395_v29  ;;  %v421_v41 = vsel %vm420_vm11, %v413_v56, %v417_v52  ;;  %v423_v48 = vsel %vm420_vm11, %v417_v52, %v413_v56 }
  0xde   : > { %v410_v51 = vadd.f32 %v406_v30, %v1505_v44  ;;  %v411_v52 = vadd.f32 %v407_v37, %v1507_v45  ;;  %v430_v44 = vsel %vm1491_vm9, %v423_v48, 0.0 }
  0xe1   : > { %v398_v58 = vpop.permute.xlu1 %397 }
  0xe2   : > { %v404_v61 = vmul.f32 %v398_v58, %v392_v59  ;;  %v405_v62 = vmul.f32 %v398_v58, %v393_v60  ;;  %v454_v2 = vpop.permute.xlu2 %453 }
  0xe3   : > { %v419_v63 = vpop.permute.xlu0 %418 }
  0xe4   : > { %v1515_v0 = vadd.f32 %v404_v61, %v371_v53  ;;  %v1517_v1 = vadd.f32 %v405_v62, %v372_v54  ;;  %v429_v53 = vsel %vm1480_vm7, %v421_v41, 0.0 }
  0xe9   : > { %v415_v9 = vpop.permute.xlu1 %414 }
  0xea   : > { %v476_v12 = vpop.permute.xlu2 %475  ;;  %v422_v23 = vsel %vm420_vm11, %v415_v9, %v419_v63  ;;  %v424_v28 = vsel %vm420_vm11, %v419_v63, %v415_v9 }
  0xeb   : > { %v450_v10 = vpop.permute.xlu0 %449  ;;  %v431_v3 = vsel %vm1480_vm7, %v422_v23, 0.0  ;;  %v432_v35 = vsel %vm1491_vm9, %v424_v28, 0.0 }
  0xec   : > { %v443_v46 = vmul.f32 %v439_v57, %v431_v3  ;;  %v444_v40 = vmul.f32 %v439_v57, %v432_v35  ;;  %v458_v49 = vsel %vm457_vm12, %v450_v10, %v454_v2  ;;  %v460_v50 = vsel %vm457_vm12, %v454_v2, %v450_v10 }
  0xed   : > { %v466_v60 = vsel %vm1427_vm2, %v458_v49, 0.0  ;;  %v467_v61 = vsel %vm1551_vm15, %v460_v50, 0.0 }
  0xee   : > { %v447_v59 = vadd.f32 %v443_v46, %v410_v51  ;;  %v448_v63 = vadd.f32 %v444_v40, %v411_v52 }
  0xf1   : > { %v435_v11 = vpop.permute.xlu1 %434 }
  0xf2   : > { %v491_v16 = vpop.permute.xlu2 %490  ;;  %v441_v2 = vmul.f32 %v435_v11, %v429_v53  ;;  %v442_v10 = vmul.f32 %v435_v11, %v430_v44 }
  0xf3   : > { %v456_v13 = vpop.permute.xlu0 %455 }
  0xf4   : > { %v445_v34 = vadd.f32 %v441_v2, %v1515_v0  ;;  %v446_v27 = vadd.f32 %v442_v10, %v1517_v1 }
  0xf9   : > { %v452_v14 = vpop.permute.xlu1 %451 }
  0xfa   : > { %v513_v19 = vpop.permute.xlu2 %512  ;;  %v459_v33 = vsel %vm457_vm12, %v452_v14, %v456_v13  ;;  %v461_v5 = vsel %vm457_vm12, %v456_v13, %v452_v14 }
  0xfb   : > { %v487_v15 = vpop.permute.xlu0 %486  ;;  %v468_v47 = vsel %vm1427_vm2, %v459_v33, 0.0  ;;  %v469_v38 = vsel %vm1551_vm15, %v461_v5, 0.0 }
  0xfc   : > { %v480_v56 = vmul.f32 %v476_v12, %v468_v47  ;;  %v481_v57 = vmul.f32 %v476_v12, %v469_v38  ;;  %v497_v58 = vsel %vm494_vm14, %v491_v16, %v487_v15  ;;  %v495_v12 = vsel %vm494_vm14, %v487_v15, %v491_v16 }
  0xfd   : > { %v504_v13 = vsel %vm223_vm13, %v497_v58, 0.0 }
 0x101   : > { %v472_v17 = vpop.permute.xlu1 %471 }
 0x102   : > { %v528_v31 = vpop.permute.xlu2 %527  ;;  %v478_v15 = vmul.f32 %v472_v17, %v466_v60  ;;  %v479_v16 = vmul.f32 %v472_v17, %v467_v61 }
 0x103   : > { %v493_v18 = vpop.permute.xlu0 %492 }
 0x104   : > { %v482_v41 = vadd.f32 %v478_v15, %v445_v34  ;;  %v483_v42 = vadd.f32 %v479_v16, %v446_v27 }
 0x109   : > { %v489_v20 = vpop.permute.xlu1 %488 }
 0x10a   : > { %v498_v43 = vsel %vm494_vm14, %v493_v18, %v489_v20  ;;  %v496_v54 = vsel %vm494_vm14, %v489_v20, %v493_v18  ;;  %v550_v39 = vpop.permute.xlu2 %549  ;;  %v484_v18 = vadd.f32 %v480_v56, %v447_v59  ;;  %v485_v20 = vadd.f32 %v481_v57, %v448_v63 }
 0x10b   : > { %v1526_v24 = vpop.permute.xlu0 %523  ;;  %v506_v55 = vsel %vm223_vm13, %v498_v43, 0.0  ;;  %v517_v9 = vmul.f32 %v513_v19, %v496_v54 }
 0x10c   : > { %v518_v45 = vmul.f32 %v513_v19, %v506_v55  ;;  %v532_v17 = vsel %vm531_vm0, %v1526_v24, %v528_v31  ;;  %v534_v30 = vsel %vm531_vm0, %v528_v31, %v1526_v24 }
 0x10d   : > { %v521_v25 = vadd.f32 %v517_v9, %v484_v18  ;;  %v540_v47 = vsel %vm1480_vm7, %v532_v17, 0.0  ;;  %v541_v26 = vsel %vm1596_vm1, %v534_v30, 0.0 }
 0x10e   : > { %v522_v28 = vadd.f32 %v518_v45, %v485_v20 }
 0x111   : > { %v509_v36 = vpop.permute.xlu1 %508 }
 0x112   : > { %v515_v33 = vmul.f32 %v509_v36, %v495_v12  ;;  %v516_v5 = vmul.f32 %v509_v36, %v504_v13 }
 0x113   : > { %v530_v62 = vpop.permute.xlu0 %529 }
 0x114   : > { %v519_v36 = vadd.f32 %v515_v33, %v482_v41  ;;  %v520_v43 = vadd.f32 %v516_v5, %v483_v42 }
 0x119   : > { %v526_v14 = vpop.permute.xlu1 %525 }
 0x11a   : > { %v533_v21 = vsel %vm531_vm0, %v526_v14, %v530_v62  ;;  %v535_v22 = vsel %vm531_vm0, %v530_v62, %v526_v14 }
 0x11b   : > { %v542_v19 = vsel %vm1480_vm7, %v533_v21, 0.0  ;;  %v543_v23 = vsel %vm1596_vm1, %v535_v22, 0.0 }
 0x11c   : > { %v554_v29 = vmul.f32 %v550_v39, %v542_v19  ;;  %v555_v3 = vmul.f32 %v550_v39, %v543_v23 }
 0x11e   : > { %v1612_v35 = vadd.f32 %v554_v29, %v521_v25  ;;  %v1614_v37 = vadd.f32 %v555_v3, %v522_v28 }
 0x120   : > { %v1617_v0 = vmul.f32 0.70710677, %v1612_v35  ;;  %v1620_v1 = vmul.f32 0.70710677, %v1614_v37 }
 0x121   : > { %v546_v46 = vpop.permute.xlu1 %545 }
 0x122   : > { %v648_v24 = vmul.f32 %v1617_v0, %v1617_v0  ;;  %v688_v31 = vmul.f32 %v1620_v1, %v1620_v1  ;;  %v552_v38 = vmul.f32 %v546_v46, %v540_v47  ;;  %v553_v48 = vmul.f32 %v546_v46, %v541_v26 }
 0x124   : > { %v1630_v40 = vmin.f32 %v648_v24, 16.0  ;;  %v1632_v49 = vmin.f32 %v688_v31, 16.0  ;;  %v1634_v50 = vadd.f32 %v552_v38, %v519_v36  ;;  %v1636_v51 = vadd.f32 %v553_v48, %v520_v43 }
 0x126   : > { %v650_v32 = vmul.f32 2.1237322e-06, %v1630_v40  ;;  %v690_v53 = vmul.f32 2.1237322e-06, %v1632_v49  ;;  %v1641_v54 = vmul.f32 0.70710677, %v1634_v50 }
 0x127   : > { %v1644_v55 = vmul.f32 0.70710677, %v1636_v51  ;;  %v661_v52 = vmul.f32 3.8918573e-05, %v1630_v40  ;;  %v701_v56 = vmul.f32 3.8918573e-05, %v1632_v49 }
 0x128   : > { %v651_v57 = vadd.f32 0.00028619796, %v650_v32  ;;  %v691_v58 = vadd.f32 0.00028619796, %v690_v53  ;;  %v568_v59 = vmul.f32 %v1641_v54, %v1641_v54 }
 0x129   : > { %v608_v44 = vmul.f32 %v1644_v55, %v1644_v55  ;;  %v662_v60 = vadd.f32 0.001143296, %v661_v52  ;;  %v702_v61 = vadd.f32 0.001143296, %v701_v56 }
 0x12a   : > { %v652_v62 = vmul.f32 %v651_v57, %v1630_v40  ;;  %v692_v63 = vmul.f32 %v691_v58, %v1632_v49  ;;  %v1654_v2 = vmin.f32 %v568_v59, 16.0 }
 0x12b   : > { %v1656_v9 = vmin.f32 %v608_v44, 16.0  ;;  %v663_v45 = vmul.f32 %v662_v60, %v1630_v40  ;;  %v703_v10 = vmul.f32 %v702_v61, %v1632_v49 }
 0x12c   : > { %v653_v12 = vadd.f32 0.0036580483, %v652_v62  ;;  %v693_v13 = vadd.f32 0.0036580483, %v692_v63  ;;  %v570_v14 = vmul.f32 2.1237322e-06, %v1654_v2 }
 0x12d   : > { %v664_v39 = vadd.f32 0.014752088, %v663_v45  ;;  %v704_v18 = vadd.f32 0.014752088, %v703_v10  ;;  %v581_v20 = vmul.f32 3.8918573e-05, %v1654_v2 }
 0x12e   : > { %v654_v21 = vmul.f32 %v653_v12, %v1630_v40  ;;  %v571_v22 = vadd.f32 0.00028619796, %v570_v14  ;;  %v610_v11 = vmul.f32 2.1237322e-06, %v1656_v9  ;;  %v621_v23 = vmul.f32 3.8918573e-05, %v1656_v9 }
 0x12f   : > { %v665_v15 = vmul.f32 %v664_v39, %v1630_v40  ;;  %v705_v16 = vmul.f32 %v704_v18, %v1632_v49  ;;  %v582_v19 = vadd.f32 0.001143296, %v581_v20  ;;  %v694_v25 = vmul.f32 %v693_v13, %v1632_v49 }
 0x130   : > { %v572_v28 = vmul.f32 %v571_v22, %v1654_v2  ;;  %v611_v29 = vadd.f32 0.00028619796, %v610_v11  ;;  %v622_v33 = vadd.f32 0.001143296, %v621_v23  ;;  %v655_v5 = vadd.f32 0.05243302, %v654_v21 }
 0x131   : > { %v666_v3 = vadd.f32 0.112945676, %v665_v15  ;;  %v706_v34 = vadd.f32 0.112945676, %v705_v16  ;;  %v583_v27 = vmul.f32 %v582_v19, %v1654_v2  ;;  %v695_v46 = vadd.f32 0.05243302, %v694_v25 }
 0x132   : > { %v573_v17 = vadd.f32 0.0036580483, %v572_v28  ;;  %v612_v30 = vmul.f32 %v611_v29, %v1656_v9  ;;  %v623_v43 = vmul.f32 %v622_v33, %v1656_v9  ;;  %v656_v38 = vmul.f32 %v655_v5, %v1630_v40 }
 0x133   : > { %v667_v41 = vmul.f32 %v666_v3, %v1630_v40  ;;  %v707_v42 = vmul.f32 %v706_v34, %v1632_v49  ;;  %v584_v36 = vadd.f32 0.014752088, %v583_v27  ;;  %v696_v58 = vmul.f32 %v695_v46, %v1632_v49 }
 0x134   : > { %v624_v31 = vadd.f32 0.014752088, %v623_v43  ;;  %v574_v48 = vmul.f32 %v573_v17, %v1654_v2  ;;  %v613_v32 = vadd.f32 0.0036580483, %v612_v30  ;;  %v657_v63 = vadd.f32 0.18741608, %v656_v38 }
 0x135   : > { %v668_v47 = vadd.f32 0.4994258, %v667_v41  ;;  %v708_v26 = vadd.f32 0.4994258, %v707_v42  ;;  %v585_v24 = vmul.f32 %v584_v36, %v1654_v2  ;;  %v697_v10 = vadd.f32 0.18741608, %v696_v58 }
 0x136   : > { %v625_v57 = vmul.f32 %v624_v31, %v1656_v9  ;;  %v575_v61 = vadd.f32 0.05243302, %v574_v48  ;;  %v614_v45 = vmul.f32 %v613_v32, %v1656_v9  ;;  %v658_v39 = vmul.f32 %v657_v63, %v1630_v40  ;;  %v742_v31 = vpop.permute.xlu1 %741 }
 0x137   : > { %v669_v53 = vmul.f32 %v668_v47, %v1630_v40  ;;  %v709_v52 = vmul.f32 %v708_v26, %v1632_v49  ;;  %v586_v56 = vadd.f32 0.112945676, %v585_v24  ;;  %v698_v21 = vmul.f32 %v697_v10, %v1632_v49 }
 0x138   : > { %v626_v62 = vadd.f32 0.112945676, %v625_v57  ;;  %v576_v13 = vmul.f32 %v575_v61, %v1654_v2  ;;  %v615_v20 = vadd.f32 0.05243302, %v614_v45  ;;  %v659_v28 = vadd.f32 1.1283791, %v658_v39 }
 0x139   : > { %v670_v59 = vadd.f32 1.0, %v669_v53  ;;  %v710_v44 = vadd.f32 1.0, %v709_v52  ;;  %v587_v60 = vmul.f32 %v586_v56, %v1654_v2  ;;  %v699_v3 = vadd.f32 1.1283791, %v698_v21 }
 0x13a   : > { %v627_v14 = vmul.f32 %v626_v62, %v1656_v9  ;;  %v577_v23 = vadd.f32 0.18741608, %v576_v13  ;;  %v616_v40 = vmul.f32 %v615_v20, %v1656_v9  ;;  %v660_v46 = vmul.f32 %v659_v28, %v1617_v0 }
 0x13b   : > { %1030 = vrcp.f32 %v670_v59  ;;  %v588_v12 = vadd.f32 0.4994258, %v587_v60  ;;  %v680_v27 = vand.u32 2147483647, %v670_v59  ;;  %v682_v33 = vand.u32 2147483648, %v670_v59 }
 0x13c   : > { %1032 = vrcp.f32 %v710_v44  ;;  %v628_v22 = vadd.f32 0.4994258, %v627_v14  ;;  %v720_v5 = vand.u32 2147483647, %v710_v44  ;;  %v722_v41 = vand.u32 2147483648, %v710_v44 }
 0x13d   : > { %v589_v18 = vmul.f32 %v588_v12, %v1654_v2  ;;  %v578_v42 = vmul.f32 %v577_v23, %v1654_v2  ;;  %v617_v43 = vadd.f32 0.18741608, %v616_v40  ;;  %v700_v47 = vmul.f32 %v699_v3, %v1620_v1 }
 0x13e   : > { %v629_v25 = vmul.f32 %v628_v22, %v1656_v9  ;;  %vm676_vm4 = vweird.f32 %v670_v59  ;;  %vm681_vm6 = vcmp.eq.f32.partialorder %v680_v27, 8.507059e+37  ;;  %v683_v38 = vor.u32 1.1754944e-38, %v682_v33 }
 0x13f   : > { %v1688_v15 = vadd.f32 1.0, %v589_v18  ;;  %vm716_vm7 = vweird.f32 %v710_v44  ;;  %vm721_vm9 = vcmp.eq.f32.partialorder %v720_v5, 8.507059e+37  ;;  %v723_v2 = vor.u32 1.1754944e-38, %v722_v41 }
 0x140   : > { %v1693_v17 = vadd.f32 1.0, %v629_v25  ;;  %v579_v56 = vadd.f32 1.1283791, %v578_v42  ;;  %v618_v1 = vmul.f32 %v617_v43, %v1656_v9  ;;  %v563_v62 = vmul.f32 0.5, %v1614_v37 }
 0x141   : > { %v1031_v11 = vpop.eup %1030  ;;  %1034 = vrcp.f32 %v1688_v15  ;;  %v600_v60 = vand.u32 2147483647, %v1688_v15  ;;  %v602_v45 = vand.u32 2147483648, %v1688_v15  ;;  %vm596_vm11 = vweird.f32 %v1688_v15 }
 0x142   : > { %v1033_v16 = vpop.eup %1032  ;;  %v672_v19 = vmul.f32 %v1031_v11, %v670_v59  ;;  %vm677_vm2 = vweird.f32 %v1031_v11  ;;  %1036 = vrcp.f32 %v1693_v17  ;;  %v580_v9 = vmul.f32 %v579_v56, %v1641_v54  ;;  %v754_v54 = vpop.permute.xlu1 %753 }
 0x143   : > { %v712_v29 = vmul.f32 %v1033_v16, %v710_v44  ;;  %vm717_vm3 = vweird.f32 %v1033_v16  ;;  %vm678_vm5 = vmor %vm676_vm4, %vm677_vm2  ;;  %v562_v44 = vmul.f32 0.5, %v1612_v35  ;;  %v619_v39 = vadd.f32 1.1283791, %v618_v1 }
 0x144   : > { %v673_v34 = vsub.f32 1.0, %v672_v19  ;;  %vm718_vm8 = vmor %vm716_vm7, %vm717_vm3  ;;  %vm601_vm12 = vcmp.eq.f32.partialorder %v600_v60, 8.507059e+37  ;;  %v603_v37 = vor.u32 1.1754944e-38, %v602_v45  ;;  %v640_v22 = vand.u32 2147483647, %v1693_v17 }
 0x145   : > { %v713_v49 = vsub.f32 1.0, %v712_v29  ;;  %vm636_vm15 = vweird.f32 %v1693_v17 }
 0x146   : > { %v674_v30 = vmul.f32 %v1031_v11, %v673_v34  ;;  %v620_v34 = vmul.f32 %v619_v39, %v1644_v55  ;;  %vm641_vm1 = vcmp.eq.f32.partialorder %v640_v22, 8.507059e+37 }
 0x147   : > { %v714_v36 = vmul.f32 %v1033_v16, %v713_v49  ;;  %v1035_v24 = vpop.eup %1034 }
 0x148   : > { %v675_v26 = vadd.f32 %v1031_v11, %v674_v30  ;;  %v592_v53 = vmul.f32 %v1035_v24, %v1688_v15  ;;  %v1037_v61 = vpop.eup %1036  ;;  %vm597_vm10 = vweird.f32 %v1035_v24 }
 0x149   : > { %v715_v48 = vadd.f32 %v1033_v16, %v714_v36  ;;  %v632_v13 = vmul.f32 %v1037_v61, %v1693_v17  ;;  %vm598_vm13 = vmor %vm596_vm11, %vm597_vm10  ;;  %vm637_vm14 = vweird.f32 %v1037_v61  ;;  %v560_v36 = vmul.f32 0.5, %v1634_v50 }
 0x14a   : > { %v679_v32 = vsel %vm678_vm5, %v1031_v11, %v675_v26  ;;  %v593_v59 = vsub.f32 1.0, %v592_v53  ;;  %v642_v11 = vand.u32 2147483648, %v1693_v17  ;;  %vm638_vm0 = vmor %vm636_vm15, %vm637_vm14 }
 0x14b   : > { %v684_v52 = vsel %vm681_vm6, %v683_v38, %v679_v32  ;;  %v719_v0 = vsel %vm718_vm8, %v1033_v16, %v715_v48  ;;  %v633_v35 = vsub.f32 1.0, %v632_v13 }
 0x14c   : > { %v685_v57 = vmul.f32 %v684_v52, %v660_v46  ;;  %v724_v58 = vsel %vm721_vm9, %v723_v2, %v719_v0  ;;  %v594_v12 = vmul.f32 %v1035_v24, %v593_v59  ;;  %v643_v27 = vor.u32 1.1754944e-38, %v642_v11 }
 0x14d   : > { %v725_v63 = vmul.f32 %v724_v58, %v700_v47  ;;  %v634_v23 = vmul.f32 %v1037_v61, %v633_v35  ;;  %v738_v47 = vpop.permute.xlu0 %737 }
 0x14e   : > { %v900_v10 = vclamps-f32 %v685_v57, 1.0  ;;  %v595_v20 = vadd.f32 %v1035_v24, %v594_v12 }
 0x14f   : > { %v901_v14 = vclamps-f32 %v725_v63, 1.0  ;;  %v635_v40 = vadd.f32 %v1037_v61, %v634_v23 }
 0x150   : > { %v730_v18 = vadd.f32 1.0, %v900_v10  ;;  %v599_v19 = vsel %vm598_vm13, %v1035_v24, %v595_v20  ;;  %v750_v24 = vpop.permute.xlu2 %749 }
 0x151   : > { %v731_v21 = vadd.f32 1.0, %v901_v14  ;;  %v604_v28 = vsel %vm601_vm12, %v603_v37, %v599_v19  ;;  %v639_v5 = vsel %vm638_vm0, %v1037_v61, %v635_v40 }
 0x152   : > { %v734_v16 = vmul.f32 %v730_v18, %v562_v44  ;;  %v605_v29 = vmul.f32 %v604_v28, %v580_v9  ;;  %v644_v41 = vsel %vm641_vm1, %v643_v27, %v639_v5 }
 0x153   : > { %v735_v25 = vmul.f32 %v731_v21, %v563_v62  ;;  %v645_v43 = vmul.f32 %v644_v41, %v620_v34 }
 0x154   : > { %v746_v15 = vmul.f32 %v742_v31, %v734_v16  ;;  %v898_v49 = vclamps-f32 %v605_v29, 1.0 }
 0x155   : > { %v747_v3 = vmul.f32 %v742_v31, %v735_v25  ;;  %v899_v55 = vclamps-f32 %v645_v43, 1.0  ;;  %v561_v31 = vmul.f32 0.5, %v1636_v51 }
 0x156   : > { %v758_v33 = vadd.f32 %v754_v54, %v746_v15  ;;  %v728_v46 = vadd.f32 1.0, %v898_v49 }
 0x157   : > { %v759_v30 = vadd.f32 %v754_v54, %v747_v3  ;;  %v729_v38 = vadd.f32 1.0, %v899_v55 }
 0x158   : > { %v762_v42 = vadd.f32 %v758_v33, %v1349_v6  ;;  %v732_v26 = vmul.f32 %v728_v46, %v560_v36 }
 0x159   : > { %v763_v17 = vadd.f32 %v759_v30, %v1354_v7  ;;  %v733_v48 = vmul.f32 %v729_v38, %v561_v31 }
 0x15a   : > { %766 = vst [vmem:[%s207_s23 + $0x10] sm:$0xff] %v762_v42  ;;  %v744_v6 = vmul.f32 %v738_v47, %v732_v26 }
 0x15b   : > { %767 = vst [vmem:[%s207_s23 + $0x18] sm:$0xff] %v763_v17  ;;  %v745_v7 = vmul.f32 %v738_v47, %v733_v48 }
 0x15c   : > { %v756_v50 = vadd.f32 %v750_v24, %v744_v6 }
 0x15d   : > { %v757_v2 = vadd.f32 %v750_v24, %v745_v7 }
 0x15e   : > { %v760_v32 = vadd.f32 %v756_v50, %v1344_v4 }
 0x15f   : > { %v761_v51 = vadd.f32 %v757_v2, %v1356_v8 }
 0x160   : > { %764 = vst [vmem:[%s207_s23] sm:$0xff] %v760_v32 }
 0x161   : > { %765 = vst [vmem:[%s207_s23 + $0x8] sm:$0xff] %v761_v51 }
 0x162   : > { %1125 = shalt.err (!%p1122_p0)
}
 0x163   : > { %s1211_s30 = smov 256  }
 0x164   : > { %915 = dma.vmem_to_hbm [thread:$0]  (%p1306_p5), %s785_s28, 512, %s787_s5, %s769_s12, %s1211_s30, %s1211_s30, %s1196_s17  }
 0x165 PF: > { %s801_s21 = sand.u32 1, %s1164_s9   ;;  %p926_p3 = pnand %p890_p11, %p1276_p6 }
 0x166   : > { %s802_s22 = scalar_lea.sflag [#allocation4], %s801_s21 }
 0x167   : > { %p927_p7 = pneg %p926_p3 }
 0x169   : > { %1159 = dma.done.wait (%p927_p7), %s802_s22, 512  }
 0x16a   : > { %1161 = vsyncadd (%p927_p7), %s802_s22, 4294966784  ;;  %s19_s14 = sadd.s32 1, %s1184_s14   ;;  %s1784_s9 = smov %s1168_s10 }
 0x16b   : > { %p16_p9 = scmp.ge.s32.totalorder %s19_s14, 4   ;;  %s1785_s10 = smov %s1172_s11 }
 0x16c   : > { %s1786_s11 = smov %s1315_s8  ;;  %s1787_s12 = smov %s1180_s13 }
 0x16d   : > { %s1788_s13 = smov %s1790_s29  ;;  %18 = sbr.rel (!%p16_p9) target bundleno = 7 (0x7), region = 78 }
 0x172   :  { %808 = vsyncpa [#allocation3], 1 }
 0x173   :  { %810 = vsyncpa [#allocation3 + $0x1], 1 }
 0x174   :  { %811 = vsyncpa [#allocation6], 1 }
 0x175   :  { %812 = vsyncpa [#allocation4], 1 }
 0x176   :  { %814 = vsyncpa [#allocation4 + $0x1], 1 }

</bundles_post_ra>
